<compile_context>
chip_gen: v5e
topology: v5e:2x2
jax: 0.10.0
libtpu: 0.0.40
codegen_flags: <defaults>
</compile_context>

<pallas_src>
import jax
import jax.numpy as jnp
from jax.experimental import pallas as pl
from jax.experimental.pallas import tpu as pltpu


# -----------------------------------------------------------------------------
# Kernels
# -----------------------------------------------------------------------------
def _conv_tower_kernel(x_ref, w1_ref, b1_ref, w2_ref, b2_ref, o_ref):
    """Fused conv1(1x1) -> maxpool2 -> relu -> conv2(1x1) -> maxpool2 -> relu.

    x_ref:  (1, Cin, P)   one sample, pixels in hierarchical (quadtree) order
    w1_ref: (Cmid, Cin)   b1_ref: (Cmid, 1)
    w2_ref: (Cout, Cmid)  b2_ref: (Cout, 1)
    o_ref:  (1, Cout, P // 16)
    """
    x = x_ref[0]                                    # (Cin, P), lane-dense
    npix = x.shape[-1]
    q = npix // 4

    # conv1: a single MXU matmul over every pixel of the sample.
    y1 = jnp.dot(w1_ref[...], x, preferred_element_type=jnp.float32)    # (Cmid, P)
    # 2x2 max-pool == elementwise max over the four contiguous corner blocks.
    p1 = jnp.maximum(jnp.maximum(y1[:, 0:q], y1[:, q:2 * q]),
                     jnp.maximum(y1[:, 2 * q:3 * q], y1[:, 3 * q:4 * q]))
    # Bias is constant across the pooling window: add once, after the pool.
    h1 = jnp.maximum(p1 + b1_ref[...], 0.0)         # (Cmid, P/4), stays in VMEM

    # Dropout2d is an identity in eval mode; conv2 on the pooled intermediate.
    y2 = jnp.dot(w2_ref[...], h1, preferred_element_type=jnp.float32)   # (Cout, P/4)
    s = q // 4
    p2 = jnp.maximum(jnp.maximum(y2[:, 0:s], y2[:, s:2 * s]),
                     jnp.maximum(y2[:, 2 * s:3 * s], y2[:, 3 * s:4 * s]))
    o_ref[0] = jnp.maximum(p2 + b2_ref[...], 0.0)   # (Cout, P/16)


def _mlp_head_kernel(x_ref, w1_ref, b1_ref, w2_ref, b2_ref, o_ref):
    """fc1 + relu + (dropout = identity in eval) + fc2 + log_softmax(dim=1)."""
    h = jnp.dot(x_ref[...], w1_ref[...], preferred_element_type=jnp.float32)
    h = jnp.maximum(h + b1_ref[...], 0.0)
    z = jnp.dot(h, w2_ref[...], preferred_element_type=jnp.float32) + b2_ref[...]
    m = jnp.max(z, axis=1, keepdims=True)
    lse = jnp.log(jnp.sum(jnp.exp(z - m), axis=1, keepdims=True)) + m
    o_ref[...] = z - lse


# -----------------------------------------------------------------------------
# Glue / wrappers
# -----------------------------------------------------------------------------
def _hierarchical_pixels(x_nchw):
    """(N, C, H, W) -> (N, C, H*W) with pixels in quadtree (corner-major) order.

    h = 4*a + 2*b + c ; w = 4*d + 2*e + f ; flat order = (c, f, b, e, a, d).
    Both 2x2 pooling stages then reduce over contiguous quarters of the last
    dim, and stripping the corner bits leaves standard (h//4, w//4) row-major
    order.  One fused XLA transpose pass; replaces the NHWC transpose and the
    four strided corner copies of the previous version.
    """
    n, ch, h, w = x_nchw.shape
    a, d = h // 4, w // 4
    x8 = x_nchw.reshape(n, ch, a, 2, 2, d, 2, 2)       # (n, ch, a, b, c, d, e, f)
    xp = jnp.transpose(x8, (0, 1, 4, 7, 3, 6, 2, 5))   # (n, ch, c, f, b, e, a, d)
    return xp.reshape(n, ch, h * w)


def conv_tower(x_nchw, w1, b1, w2, b2):
    """Fused conv1+pool+relu+conv2+pool+relu. Returns (N, Cout, H/4 * W/4)."""
    n, cin, h, w = x_nchw.shape
    assert h % 4 == 0 and w % 4 == 0, "H and W must be divisible by 4"
    assert cin == w1.shape[1]
    cmid, cout = w1.shape[0], w2.shape[0]
    npix = h * w
    s_out = npix // 16

    xh = _hierarchical_pixels(x_nchw)                  # (N, Cin, H*W)

    return pl.pallas_call(
        _conv_tower_kernel,
        out_shape=jax.ShapeDtypeStruct((n, cout, s_out), jnp.float32),
        grid=(n,),
        in_specs=[
            pl.BlockSpec((1, cin, npix), lambda i: (i, 0, 0)),
            pl.BlockSpec((cmid, cin), lambda i: (0, 0)),    # resident weights
            pl.BlockSpec((cmid, 1), lambda i: (0, 0)),
            pl.BlockSpec((cout, cmid), lambda i: (0, 0)),
            pl.BlockSpec((cout, 1), lambda i: (0, 0)),
        ],
        out_specs=pl.BlockSpec((1, cout, s_out), lambda i: (i, 0, 0)),
        compiler_params=pltpu.CompilerParams(
            dimension_semantics=("parallel",),
            vmem_limit_bytes=32 * 1024 * 1024,
        ),
    )(xh, w1, b1, w2, b2)


def mlp_head(x2d, w1, b1, w2, b2):
    """x2d: (R, 128) -> log-probs (R, 16)."""
    r = x2d.shape[0]
    d_in, d_hid = w1.shape
    d_out = w2.shape[1]
    tile_r = r if r <= 512 else 512
    return pl.pallas_call(
        _mlp_head_kernel,
        out_shape=jax.ShapeDtypeStruct((r, d_out), jnp.float32),
        grid=(pl.cdiv(r, tile_r),),
        in_specs=[
            pl.BlockSpec((tile_r, d_in), lambda i: (i, 0)),
            pl.BlockSpec((d_in, d_hid), lambda i: (0, 0)),
            pl.BlockSpec((1, d_hid), lambda i: (0, 0)),
            pl.BlockSpec((d_hid, d_out), lambda i: (0, 0)),
            pl.BlockSpec((1, d_out), lambda i: (0, 0)),
        ],
        out_specs=pl.BlockSpec((tile_r, d_out), lambda i: (i, 0)),
        compiler_params=pltpu.CompilerParams(
            dimension_semantics=("parallel",),
            vmem_limit_bytes=32 * 1024 * 1024,
        ),
    )(x2d, w1, b1, w2, b2)


def net_forward(x_nchw, params):
    """x_nchw: (N, 24, H, W) float32; H, W divisible by 4."""
    conv_out = conv_tower(x_nchw, params["conv1_w"], params["conv1_b"],
                          params["conv2_w"], params["conv2_b"])   # (N, 24, H/4*W/4)
    # conv_out is already in NCHW row-major order, so torch's x.view(-1, 128)
    # is a plain contiguous reshape (no runtime transpose).
    assert conv_out.size % 128 == 0
    x2d = conv_out.reshape(-1, 128)
    return mlp_head(x2d, params["fc1_w"], params["fc1_b"],
                    params["fc2_w"], params["fc2_b"])


# -----------------------------------------------------------------------------
# Pure-JAX (XLA) reference of the same eval-mode forward, for validation.
# -----------------------------------------------------------------------------
def net_forward_ref(x, params):
    n, _, h, w = x.shape
    y = jnp.einsum("oc,nchw->nohw", params["conv1_w"], x) \
        + params["conv1_b"].reshape(1, -1, 1, 1)
    y = y.reshape(n, 48, h // 2, 2, w // 2, 2).max(axis=(3, 5))
    y = jnp.maximum(y, 0.0)
    z = jnp.einsum("oc,nchw->nohw", params["conv2_w"], y) \
        + params["conv2_b"].reshape(1, -1, 1, 1)
    z = z.reshape(n, 24, h // 4, 2, w // 4, 2).max(axis=(3, 5))
    z = jnp.maximum(z, 0.0)
    f = z.reshape(-1, 128)
    hh = jnp.maximum(f @ params["fc1_w"] + params["fc1_b"], 0.0)
    logits = hh @ params["fc2_w"] + params["fc2_b"]
    return jax.nn.log_softmax(logits, axis=1)


# -----------------------------------------------------------------------------
# Parameters (torch default init: U(-1/sqrt(fan_in), 1/sqrt(fan_in)))
# -----------------------------------------------------------------------------
def init_params(key):
    ks = jax.random.split(key, 8)

    def conv_p(kw, kb, cin, cout):
        sc = 1.0 / jnp.sqrt(jnp.float32(cin))
        w = jax.random.uniform(kw, (cout, cin), jnp.float32, -sc, sc)
        b = jax.random.uniform(kb, (cout, 1), jnp.float32, -sc, sc)
        return w, b

    def fc_p(kw, kb, fin, fout):
        sc = 1.0 / jnp.sqrt(jnp.float32(fin))
        w = jax.random.uniform(kw, (fin, fout), jnp.float32, -sc, sc)
        b = jax.random.uniform(kb, (1, fout), jnp.float32, -sc, sc)
        return w, b

    c1w, c1b = conv_p(ks[0], ks[1], 24, 48)    # conv1: 1x1 conv == (Cout, Cin) matmul
    c2w, c2b = conv_p(ks[2], ks[3], 48, 24)    # conv2
    f1w, f1b = fc_p(ks[4], ks[5], 128, 64)     # fc1
    f2w, f2b = fc_p(ks[6], ks[7], 64, 16)      # fc2
    return {"conv1_w": c1w, "conv1_b": c1b,
            "conv2_w": c2w, "conv2_b": c2b,
            "fc1_w": f1w, "fc1_b": f1b,
            "fc2_w": f2w, "fc2_b": f2b}


if __name__ == "__main__":
    key = jax.random.PRNGKey(0)
    pkey, xkey = jax.random.split(key)
    params = init_params(pkey)
    # (N=2, C=24, H=16, W=16): after two /2 pools -> (2, 24, 4, 4);
    # view(-1, 128) -> (6, 128); output -> (6, 16).
    x = jax.random.normal(xkey, (2, 24, 16, 16), jnp.float32)

    out = jax.jit(net_forward)(x, params)
    out = jax.block_until_ready(out)

    assert out.shape == (6, 16), out.shape
    # log_softmax sanity: each row exponentiates and sums to ~1.
    row_sums = jnp.sum(jnp.exp(out), axis=1)
    assert bool(jnp.all(jnp.abs(row_sums - 1.0) < 1e-4)), row_sums
    # Validate against the pure-JAX reference (loose tol: MXU vs XLA f32 paths).
    ref = jax.block_until_ready(jax.jit(net_forward_ref)(x, params))
    max_err = float(jnp.max(jnp.abs(out - ref)))
    assert bool(jnp.allclose(out, ref, atol=5e-2, rtol=0.0)), max_err
    print("KERNEL_OK")
</pallas_src>

<mosaic_0001>
module attributes {stable_mosaic.version = 11 : i64} {
  func.func @_conv_tower_kernel(%arg0: i32, %arg1: memref<1x24x256xf32, #tpu.memory_space<vmem>>, %arg2: memref<48x24xf32, #tpu.memory_space<vmem>>, %arg3: memref<48x1xf32, #tpu.memory_space<vmem>>, %arg4: memref<24x48xf32, #tpu.memory_space<vmem>>, %arg5: memref<24x1xf32, #tpu.memory_space<vmem>>, %arg6: memref<1x24x16xf32, #tpu.memory_space<vmem>>) attributes {dimension_semantics = [#tpu.dimension_semantics<parallel>], iteration_bounds = array<i64: 2>, scalar_prefetch = 0 : i64, scratch_operands = 0 : i64, tpu.core_type = #tpu.core_type<tc>, window_params = [{transform_indices = @transform_0, window_bounds = array<i64: 1, 24, 256>}, {pipeline_mode = #tpu.pipeline_mode<synchronous>, transform_indices = @transform_1, window_bounds = array<i64: 48, 24>}, {pipeline_mode = #tpu.pipeline_mode<synchronous>, transform_indices = @transform_2, window_bounds = array<i64: 48, 1>}, {pipeline_mode = #tpu.pipeline_mode<synchronous>, transform_indices = @transform_3, window_bounds = array<i64: 24, 48>}, {pipeline_mode = #tpu.pipeline_mode<synchronous>, transform_indices = @transform_4, window_bounds = array<i64: 24, 1>}, {transform_indices = @transform_5, window_bounds = array<i64: 1, 24, 16>}]} {
    %c0 = arith.constant 0 : index
    %c0_0 = arith.constant 0 : index
    %c0_1 = arith.constant 0 : index
    %0 = vector.load %arg1[%c0, %c0_0, %c0_1] : memref<1x24x256xf32, #tpu.memory_space<vmem>>, vector<1x24x256xf32>
    %1 = vector.shape_cast %0 : vector<1x24x256xf32> to vector<24x256xf32>
    %c0_2 = arith.constant 0 : index
    %c0_3 = arith.constant 0 : index
    %2 = vector.load %arg2[%c0_2, %c0_3] : memref<48x24xf32, #tpu.memory_space<vmem>>, vector<48x24xf32>
    %cst = arith.constant dense<0.000000e+00> : vector<48x256xf32>
    %3 = tpu.matmul %2, %1, %cst {dimension_numbers = #tpu.dot_dimension_numbers<[1], [0], [0], [1], [0, 0, 1, 1], [], []>} : vector<48x24xf32>, vector<24x256xf32>, vector<48x256xf32> -> vector<48x256xf32>
    %4 = vector.extract_strided_slice %3 {offsets = [0, 0], sizes = [48, 64], strides = [1, 1]} : vector<48x256xf32> to vector<48x64xf32>
    %5 = vector.extract_strided_slice %3 {offsets = [0, 64], sizes = [48, 64], strides = [1, 1]} : vector<48x256xf32> to vector<48x64xf32>
    %6 = arith.maximumf %4, %5 : vector<48x64xf32>
    %7 = vector.extract_strided_slice %3 {offsets = [0, 128], sizes = [48, 64], strides = [1, 1]} : vector<48x256xf32> to vector<48x64xf32>
    %8 = vector.extract_strided_slice %3 {offsets = [0, 192], sizes = [48, 64], strides = [1, 1]} : vector<48x256xf32> to vector<48x64xf32>
    %9 = arith.maximumf %7, %8 : vector<48x64xf32>
    %10 = arith.maximumf %6, %9 : vector<48x64xf32>
    %c0_4 = arith.constant 0 : index
    %c0_5 = arith.constant 0 : index
    %11 = vector.load %arg3[%c0_4, %c0_5] : memref<48x1xf32, #tpu.memory_space<vmem>>, vector<48x1xf32>
    %12 = vector.broadcast %11 : vector<48x1xf32> to vector<48x64xf32>
    %13 = arith.addf %10, %12 : vector<48x64xf32>
    %cst_6 = arith.constant 0.000000e+00 : f32
    %14 = vector.broadcast %cst_6 : f32 to vector<48x64xf32>
    %15 = arith.maximumf %13, %14 : vector<48x64xf32>
    %c0_7 = arith.constant 0 : index
    %c0_8 = arith.constant 0 : index
    %16 = vector.load %arg4[%c0_7, %c0_8] : memref<24x48xf32, #tpu.memory_space<vmem>>, vector<24x48xf32>
    %cst_9 = arith.constant dense<0.000000e+00> : vector<24x64xf32>
    %17 = tpu.matmul %16, %15, %cst_9 {dimension_numbers = #tpu.dot_dimension_numbers<[1], [0], [0], [1], [0, 0, 1, 1], [], []>} : vector<24x48xf32>, vector<48x64xf32>, vector<24x64xf32> -> vector<24x64xf32>
    %18 = vector.extract_strided_slice %17 {offsets = [0, 0], sizes = [24, 16], strides = [1, 1]} : vector<24x64xf32> to vector<24x16xf32>
    %19 = vector.extract_strided_slice %17 {offsets = [0, 16], sizes = [24, 16], strides = [1, 1]} : vector<24x64xf32> to vector<24x16xf32>
    %20 = arith.maximumf %18, %19 : vector<24x16xf32>
    %21 = vector.extract_strided_slice %17 {offsets = [0, 32], sizes = [24, 16], strides = [1, 1]} : vector<24x64xf32> to vector<24x16xf32>
    %22 = vector.extract_strided_slice %17 {offsets = [0, 48], sizes = [24, 16], strides = [1, 1]} : vector<24x64xf32> to vector<24x16xf32>
    %23 = arith.maximumf %21, %22 : vector<24x16xf32>
    %24 = arith.maximumf %20, %23 : vector<24x16xf32>
    %c0_10 = arith.constant 0 : index
    %c0_11 = arith.constant 0 : index
    %25 = vector.load %arg5[%c0_10, %c0_11] : memref<24x1xf32, #tpu.memory_space<vmem>>, vector<24x1xf32>
    %26 = vector.broadcast %25 : vector<24x1xf32> to vector<24x16xf32>
    %27 = arith.addf %24, %26 : vector<24x16xf32>
    %cst_12 = arith.constant 0.000000e+00 : f32
    %28 = vector.broadcast %cst_12 : f32 to vector<24x16xf32>
    %29 = arith.maximumf %27, %28 : vector<24x16xf32>
    %c0_13 = arith.constant 0 : index
    %c0_14 = arith.constant 0 : index
    %c0_15 = arith.constant 0 : index
    %30 = vector.load %arg6[%c0_13, %c0_14, %c0_15] : memref<1x24x16xf32, #tpu.memory_space<vmem>>, vector<1x24x16xf32>
    %31 = vector.shape_cast %30 : vector<1x24x16xf32> to vector<24x16xf32>
    %32 = vector.shape_cast %29 : vector<24x16xf32> to vector<1x24x16xf32>
    tpu.vector_store %arg6[%c0_13, %c0_14, %c0_15], %32 {strides = array<i32>} : memref<1x24x16xf32, #tpu.memory_space<vmem>>, vector<1x24x16xf32>,
    return
  }
  func.func @transform_0(%arg0: i32) -> (i32, i32, i32) {
    %c0_i32 = arith.constant 0 : i32
    %c0_i32_0 = arith.constant 0 : i32
    %c0_i32_1 = arith.constant 0 : i32
    return %arg0, %c0_i32, %c0_i32_0 : i32, i32, i32
  }
  func.func @transform_1(%arg0: i32) -> (i32, i32) {
    %c0_i32 = arith.constant 0 : i32
    %c0_i32_0 = arith.constant 0 : i32
    %c0_i32_1 = arith.constant 0 : i32
    return %c0_i32, %c0_i32_0 : i32, i32
  }
  func.func @transform_2(%arg0: i32) -> (i32, i32) {
    %c0_i32 = arith.constant 0 : i32
    %c0_i32_0 = arith.constant 0 : i32
    %c0_i32_1 = arith.constant 0 : i32
    return %c0_i32, %c0_i32_0 : i32, i32
  }
  func.func @transform_3(%arg0: i32) -> (i32, i32) {
    %c0_i32 = arith.constant 0 : i32
    %c0_i32_0 = arith.constant 0 : i32
    %c0_i32_1 = arith.constant 0 : i32
    return %c0_i32, %c0_i32_0 : i32, i32
  }
  func.func @transform_4(%arg0: i32) -> (i32, i32) {
    %c0_i32 = arith.constant 0 : i32
    %c0_i32_0 = arith.constant 0 : i32
    %c0_i32_1 = arith.constant 0 : i32
    return %c0_i32, %c0_i32_0 : i32, i32
  }
  func.func @transform_5(%arg0: i32) -> (i32, i32, i32) {
    %c0_i32 = arith.constant 0 : i32
    %c0_i32_0 = arith.constant 0 : i32
    %c0_i32_1 = arith.constant 0 : i32
    return %arg0, %c0_i32, %c0_i32_0 : i32, i32, i32
  }
}

module attributes {stable_mosaic.version = 11 : i64} {
  func.func @_mlp_head_kernel(%arg0: i32, %arg1: memref<6x128xf32, #tpu.memory_space<vmem>>, %arg2: memref<128x64xf32, #tpu.memory_space<vmem>>, %arg3: memref<1x64xf32, #tpu.memory_space<vmem>>, %arg4: memref<64x16xf32, #tpu.memory_space<vmem>>, %arg5: memref<1x16xf32, #tpu.memory_space<vmem>>, %arg6: memref<6x16xf32, #tpu.memory_space<vmem>>) attributes {dimension_semantics = [#tpu.dimension_semantics<parallel>], iteration_bounds = array<i64: 1>, scalar_prefetch = 0 : i64, scratch_operands = 0 : i64, tpu.core_type = #tpu.core_type<tc>, window_params = [{transform_indices = @transform_0, window_bounds = array<i64: 6, 128>}, {pipeline_mode = #tpu.pipeline_mode<synchronous>, transform_indices = @transform_1, window_bounds = array<i64: 128, 64>}, {pipeline_mode = #tpu.pipeline_mode<synchronous>, transform_indices = @transform_2, window_bounds = array<i64: 1, 64>}, {pipeline_mode = #tpu.pipeline_mode<synchronous>, transform_indices = @transform_3, window_bounds = array<i64: 64, 16>}, {pipeline_mode = #tpu.pipeline_mode<synchronous>, transform_indices = @transform_4, window_bounds = array<i64: 1, 16>}, {transform_indices = @transform_5, window_bounds = array<i64: 6, 16>}]} {
    %c0 = arith.constant 0 : index
    %c0_0 = arith.constant 0 : index
    %0 = vector.load %arg1[%c0, %c0_0] : memref<6x128xf32, #tpu.memory_space<vmem>>, vector<6x128xf32>
    %c0_1 = arith.constant 0 : index
    %c0_2 = arith.constant 0 : index
    %1 = vector.load %arg2[%c0_1, %c0_2] : memref<128x64xf32, #tpu.memory_space<vmem>>, vector<128x64xf32>
    %cst = arith.constant dense<0.000000e+00> : vector<6x64xf32>
    %2 = tpu.matmul %0, %1, %cst {dimension_numbers = #tpu.dot_dimension_numbers<[1], [0], [0], [1], [0, 0, 1, 1], [], []>} : vector<6x128xf32>, vector<128x64xf32>, vector<6x64xf32> -> vector<6x64xf32>
    %c0_3 = arith.constant 0 : index
    %c0_4 = arith.constant 0 : index
    %3 = vector.load %arg3[%c0_3, %c0_4] : memref<1x64xf32, #tpu.memory_space<vmem>>, vector<1x64xf32>
    %4 = vector.broadcast %3 : vector<1x64xf32> to vector<6x64xf32>
    %5 = arith.addf %2, %4 : vector<6x64xf32>
    %cst_5 = arith.constant 0.000000e+00 : f32
    %6 = vector.broadcast %cst_5 : f32 to vector<6x64xf32>
    %7 = arith.maximumf %5, %6 : vector<6x64xf32>
    %c0_6 = arith.constant 0 : index
    %c0_7 = arith.constant 0 : index
    %8 = vector.load %arg4[%c0_6, %c0_7] : memref<64x16xf32, #tpu.memory_space<vmem>>, vector<64x16xf32>
    %cst_8 = arith.constant dense<0.000000e+00> : vector<6x16xf32>
    %9 = tpu.matmul %7, %8, %cst_8 {dimension_numbers = #tpu.dot_dimension_numbers<[1], [0], [0], [1], [0, 0, 1, 1], [], []>} : vector<6x64xf32>, vector<64x16xf32>, vector<6x16xf32> -> vector<6x16xf32>
    %c0_9 = arith.constant 0 : index
    %c0_10 = arith.constant 0 : index
    %10 = vector.load %arg5[%c0_9, %c0_10] : memref<1x16xf32, #tpu.memory_space<vmem>>, vector<1x16xf32>
    %11 = vector.broadcast %10 : vector<1x16xf32> to vector<6x16xf32>
    %12 = arith.addf %9, %11 : vector<6x16xf32>
    %cst_11 = arith.constant dense<0xFF800000> : vector<6xf32>
    %13 = vector.multi_reduction <maximumf>, %12, %cst_11 [1] : vector<6x16xf32> to vector<6xf32>
    %14 = vector.shape_cast %13 : vector<6xf32> to vector<6x1xf32>
    %15 = vector.broadcast %14 : vector<6x1xf32> to vector<6x16xf32>
    %16 = arith.subf %12, %15 : vector<6x16xf32>
    %17 = math.exp %16 : vector<6x16xf32>
    %cst_12 = arith.constant dense<0.000000e+00> : vector<6xf32>
    %18 = vector.multi_reduction <add>, %17, %cst_12 [1] : vector<6x16xf32> to vector<6xf32>
    %19 = vector.shape_cast %18 : vector<6xf32> to vector<6x1xf32>
    %20 = math.log %19 : vector<6x1xf32>
    %21 = arith.addf %20, %14 : vector<6x1xf32>
    %22 = vector.broadcast %21 : vector<6x1xf32> to vector<6x16xf32>
    %23 = arith.subf %12, %22 : vector<6x16xf32>
    %c0_13 = arith.constant 0 : index
    %c0_14 = arith.constant 0 : index
    %24 = vector.load %arg6[%c0_13, %c0_14] : memref<6x16xf32, #tpu.memory_space<vmem>>, vector<6x16xf32>
    tpu.vector_store %arg6[%c0_13, %c0_14], %23 {strides = array<i32>} : memref<6x16xf32, #tpu.memory_space<vmem>>, vector<6x16xf32>,
    return
  }
  func.func @transform_0(%arg0: i32) -> (i32, i32) {
    %c0_i32 = arith.constant 0 : i32
    %c0_i32_0 = arith.constant 0 : i32
    return %arg0, %c0_i32 : i32, i32
  }
  func.func @transform_1(%arg0: i32) -> (i32, i32) {
    %c0_i32 = arith.constant 0 : i32
    %c0_i32_0 = arith.constant 0 : i32
    %c0_i32_1 = arith.constant 0 : i32
    return %c0_i32, %c0_i32_0 : i32, i32
  }
  func.func @transform_2(%arg0: i32) -> (i32, i32) {
    %c0_i32 = arith.constant 0 : i32
    %c0_i32_0 = arith.constant 0 : i32
    %c0_i32_1 = arith.constant 0 : i32
    return %c0_i32, %c0_i32_0 : i32, i32
  }
  func.func @transform_3(%arg0: i32) -> (i32, i32) {
    %c0_i32 = arith.constant 0 : i32
    %c0_i32_0 = arith.constant 0 : i32
    %c0_i32_1 = arith.constant 0 : i32
    return %c0_i32, %c0_i32_0 : i32, i32
  }
  func.func @transform_4(%arg0: i32) -> (i32, i32) {
    %c0_i32 = arith.constant 0 : i32
    %c0_i32_0 = arith.constant 0 : i32
    %c0_i32_1 = arith.constant 0 : i32
    return %c0_i32, %c0_i32_0 : i32, i32
  }
  func.func @transform_5(%arg0: i32) -> (i32, i32) {
    %c0_i32 = arith.constant 0 : i32
    %c0_i32_0 = arith.constant 0 : i32
    return %arg0, %c0_i32 : i32, i32
  }
}

</mosaic_0001>

<bundles_post_ra>
// kernel: net_forward.3
= control target key start
LH: loop header
LB: loop body
LE: loop exit
PB: predicated region body
PF: predicated region fallthrough
CT: control target
= control target key end

     0   :  { %s282_s0 = inlined_call_operand.vmem [shape: f32[6,128], index: 0, kind: input, shape index: {}]   ;;  %s283_s1 = inlined_call_operand.vmem [shape: f32[128,64], index: 1, kind: input, shape index: {}]   ;;  %s284_s2 = inlined_call_operand.vmem [shape: f32[1,64], index: 2, kind: input, shape index: {}]   ;;  %s285_s3 = inlined_call_operand.vmem [shape: f32[64,16], index: 3, kind: input, shape index: {}]   ;;  %s286_s4 = inlined_call_operand.vmem [shape: f32[1,16], index: 4, kind: input, shape index: {}]   ;;  %s287_s5 = inlined_call_operand.hbm [shape: f32[6,16], index: 5, kind: output, shape index: {}]  }
   0x1   :  { %v37_v0 = vld [vmem:[%s283_s1 + $0x78] sm:$0xff]  ;;  %v36_v1 = vld [vmem:[%s283_s1 + $0x70] sm:$0xff]  ;;  %v35_v2 = vld [vmem:[%s283_s1 + $0x68] sm:$0xff] }
   0x2   :  { %42 = vmatpush.msra.mxu0 %v37_v0  ;;  %v34_v3 = vld [vmem:[%s283_s1 + $0x60] sm:$0xff]  ;;  %v70_v4 = vld [vmem:[%s285_s3 + $0x38] sm:$0xff]  ;;  %v69_v6 = vld [vmem:[%s285_s3 + $0x30] sm:$0xff] }
   0x3   :  { %v33_v5 = vld [vmem:[%s283_s1 + $0x58] sm:$0xff]  ;;  %87 = vmatpush.msra.mxu1 %v70_v4  ;;  %v68_v7 = vld [vmem:[%s285_s3 + $0x28] sm:$0xff]  ;;  %v32_v8 = vld [vmem:[%s283_s1 + $0x50] sm:$0xff] }
   0x4   :  { %43 = vmatpush.msra.mxu0 %v36_v1 }
   0x5   :  { %88 = vmatpush.msra.mxu1 %v69_v6 }
   0x6   :  { %44 = vmatpush.msra.mxu0 %v35_v2 }
   0x8   :  { %45 = vmatpush.msra.mxu0 %v34_v3 }
   0x9   :  { %10 = vsyncpa [#allocation3], 0  ;;  %v67_v9 = vld [vmem:[%s285_s3 + $0x20] sm:$0xff]  ;;  %v31_v10 = vld [vmem:[%s283_s1 + $0x48] sm:$0xff]  ;;  %89 = vmatpush.msra.mxu1 %v68_v7  ;;  %vm75_vm0 = vcmask 523264   ;;  %vm99_vm1 = vcmask 128000  }
   0xa   :  { %46 = vmatpush.msra.mxu0 %v33_v5  ;;  %v66_v11 = vld [vmem:[%s285_s3 + $0x18] sm:$0xff]  ;;  %v30_v12 = vld [vmem:[%s283_s1 + $0x40] sm:$0xff]  ;;  %v28_v14 = vld [vmem:[%s283_s1 + $0x30] sm:$0xff]  ;;  %s121_s21 = sshll.u32 %s287_s5, 4  ;;  %s122_s21 = int_to_ptr.hbm [resolvable:$true] %s121_s21 }
   0xb   :  { %90 = vmatpush.msra.mxu1 %v67_v9  ;;  %v29_v13 = vld [vmem:[%s283_s1 + $0x38] sm:$0xff]  ;;  %v27_v15 = vld [vmem:[%s283_s1 + $0x28] sm:$0xff]  ;;  %v26_v16 = vld [vmem:[%s283_s1 + $0x20] sm:$0xff] }
   0xc   :  { %47 = vmatpush.msra.mxu0 %v32_v8  ;;  %v25_v17 = vld [vmem:[%s283_s1 + $0x18] sm:$0xff]  ;;  %v24_v18 = vld [vmem:[%s283_s1 + $0x10] sm:$0xff]  ;;  %v23_v19 = vld [vmem:[%s283_s1 + $0x8] sm:$0xff] }
   0xd   :  { %91 = vmatpush.msra.mxu1 %v66_v11  ;;  %v22_v20 = vld [vmem:[%s283_s1] sm:$0xff]  ;;  %v65_v22 = vld [vmem:[%s285_s3 + $0x10] sm:$0xff]  ;;  %v64_v23 = vld [vmem:[%s285_s3 + $0x8] sm:$0xff] }
   0xe   :  { %48 = vmatpush.msra.mxu0 %v31_v10  ;;  %v21_v21 = vld [vmem:[%s282_s0] sm:$0x3f] }
   0xf   :  { %92 = vmatpush.msra.mxu1 %v65_v22  ;;  %v63_v24 = vld [vmem:[%s285_s3] sm:$0xff] }
  0x10   :  { %49 = vmatpush.msra.mxu0 %v30_v12  ;;  %v132_v25 = vld [vmem:[%s284_s2] ss:$0 sm:$0xff]  ;;  %s164_s2 = smov [#allocation2]  }
  0x11   :  { %93 = vmatpush.msra.mxu1 %v64_v23  ;;  %v133_v29 = vld [vmem:[%s286_s4] ss:$0 sm:$0xff]  ;;  %s119_s3 = sshll.u32 %s164_s2, 4  ;;  %s120_s3 = int_to_ptr.vmem [resolvable:$true] %s119_s3 }
  0x12   :  { %50 = vmatpush.msra.mxu0 %v29_v13 }
  0x13   :  { %94 = vmatpush.msra.mxu1 %v63_v24 }
  0x14   :  { %51 = vmatpush.msra.mxu0 %v28_v14 }
  0x16   :  { %52 = vmatpush.msra.mxu0 %v27_v15 }
  0x18   :  { %53 = vmatpush.msra.mxu0 %v26_v16 }
  0x1a   :  { %54 = vmatpush.msra.mxu0 %v25_v17 }
  0x1c   :  { %55 = vmatpush.msra.mxu0 %v24_v18 }
  0x1e   :  { %56 = vmatpush.msra.mxu0 %v23_v19 }
  0x20   :  { %57 = vmatpush.msra.mxu0 %v22_v20 }
  0x21   :  { %58 = vmatmul.f32.vlgmr.msra.gmra.mxu0 %v21_v21 }
  0x9e   :  { %v59_v26 = vpop.f32.mrf.mxu0 }
  0x9f   :  { %v60_v27 = vadd.f32 %v132_v25, %v59_v26 }
  0xa1   :  { %v62_v28 = vmax.f32 %v60_v27, 0.0 }
  0xa3   :  { %130 = vmatmul.msk.f32.vlgmr.msra.gmra.mxu1 %vm75_vm0, %v62_v28 }
 0x120   :  { %v96_v30 = vpop.f32.mrf.mxu1 }
 0x121   :  { %v97_v31 = vadd.f32 %v133_v29, %v96_v30 }
 0x123   :  { %v100_v32 = vsel %vm99_vm1, %v97_v31, -inf }
 0x124   :  { %101 = vmax.xlane.f32.xlu0 %v100_v32 }
 0x197   :  { %v102_v33 = vpop.xlane.xlu0 %101 }
 0x198   :  { %v103_v34 = vsub.f32 %v97_v31, %v102_v33 }
 0x19a   :  { %v104_v35 = vmul.f32 1.442695, %v103_v34 }
 0x19c   :  { %134 = vpow2.f32 %v104_v35 }
 0x1a2   :  { %v135_v36 = vpop.eup %134 }
 0x1a3   :  { %v106_v37 = vsel %vm99_vm1, %v135_v36, 0.0 }
 0x1a4   :  { %107 = vadd.xlane.f32.xlu0 %v106_v37 }
 0x217   :  { %v108_v38 = vpop.xlane.xlu0 %107 }
 0x218   :  { %136 = vlog2.f32 %v108_v38 }
 0x21e   :  { %v137_v39 = vpop.eup %136 }
 0x21f   :  { %v110_v40 = vmul.f32 0.6931472, %v137_v39 }
 0x221   :  { %v111_v41 = vadd.f32 %v110_v40, %v102_v33 }
 0x223   :  { %v112_v42 = vsub.f32 %v97_v31, %v111_v41 }
 0x225   :  { %113 = vst.msk [vmem:[#allocation2] sm:$0x3f] %vm99_vm1, %v112_v42 }
 0x226   :  { %124 = dma.vmem_to_hbm [thread:$0]  %s120_s3, 128, %s122_s21, [#allocation3]  }
 0x227   :  { %162 = dma.done.wait [#allocation3], 128  }
 0x228   :  { %163 = vsyncadd [#allocation3], 4294967168 }
 0x229   :  { %129 = vsyncpa [#allocation3], 1 }

// kernel: net_forward.2
= control target key start
LH: loop header
LB: loop body
LE: loop exit
PB: predicated region body
PF: predicated region fallthrough
CT: control target
= control target key end

     0   :  { %s681_s18 = smov 0   ;;  %s776_s0 = inlined_call_operand.vmem [shape: f32[2,24,256], index: 0, kind: input, shape index: {}]   ;;  %s777_s1 = inlined_call_operand.vmem [shape: f32[48,24], index: 1, kind: input, shape index: {}]   ;;  %s778_s2 = inlined_call_operand.vmem [shape: f32[48,1], index: 2, kind: input, shape index: {}]   ;;  %s779_s3 = inlined_call_operand.vmem [shape: f32[24,48], index: 3, kind: input, shape index: {}]   ;;  %s780_s4 = inlined_call_operand.vmem [shape: f32[24,1], index: 4, kind: input, shape index: {}]   ;;  %s781_s5 = inlined_call_operand.vmem [shape: f32[2,24,16], index: 5, kind: output, shape index: {}]  }
   0x1 LB: > { %s592_s19 = sadd.s32 4294967295, %s645_s18   ;;  %p596_p0 = scmp.ge.s32.totalorder %s645_s18, 1  ;;  %s645_s18 = sphi %s681_s18, %s15_s18  }
   0x2   : > { %p187_p1 = scmp.lt.s32.totalorder %s645_s18, 3 }
   0x4   : > { %p188_p2 = pnand %p596_p0, %p187_p1 }
   0x5   : > { %p215_p3 = scmp.lt.s32.totalorder (!%p188_p2), %s592_s19, 1  ;;  %s648_s17 = smov (!%p188_p2), 64  }
   0x6   : > { %191 = sbr.rel (%p188_p2) target bundleno = 707 (0x2c3), region = 40  ;;  %s649_s7 = smov (!%p188_p2), 112  }
   0x7   : > { %s650_s8 = smov (!%p188_p2), 96  }
   0xb   : > { %s783_s19 = smov (!%p215_p3, %s592_s19), 1  ;;  %v396_v0 = vld [vmem:[%s778_s2 + $0x20] sm:$0xff]  ;;  %v647_v4 = vmov 0   ;;  %vm237_vm0 = vcmask 195584   ;;  %v395_v10 = vld [vmem:[%s778_s2 + $0x18] sm:$0xff]  ;;  %v232_v11 = vld [vmem:[%s777_s1 + $0x8] sm:$0xff] }
   0xc   : > { %s622_s20 = smul.u32 48, %s783_s19  ;;  %637 = vset.pattern.permute.xlu1 %v647_v4  ;;  %636 = vset.pattern.permute.xlu0 %v647_v4  ;;  %v231_v8 = vld [vmem:[%s777_s1] sm:$0xff]  ;;  %v236_v12 = vld [vmem:[%s777_s1 + $0x28] sm:$0xff]  ;;  %v233_v13 = vld [vmem:[%s777_s1 + $0x10] sm:$0xff]  ;;  %vm443_vm1 = vcmask 392192   ;;  %vm533_vm2 = vcmask 130048  }
   0xd   : > { %420 = vperm.xlu1 %637, %v396_v0   ;;  %v235_v9 = vld [vmem:[%s777_s1 + $0x20] sm:$0xff]  ;;  %638 = vset.pattern.permute.xlu2 %v647_v4  ;;  %v234_v14 = vld [vmem:[%s777_s1 + $0x18] sm:$0xff]  ;;  %v397_v15 = vld [vmem:[%s778_s2 + $0x28] sm:$0xff]  ;;  %s623_s15 = smul.u32 24, %s783_s19 }
   0xe   : > { %s219_s23 = scalar_lea.vmem %s776_s0, %s622_s20  ;;  %425 = vperm.xlu0 %636, %v397_v15   ;;  %v394_v26 = vld [vmem:[%s778_s2 + $0x10] sm:$0xff]  ;;  %v393_v29 = vld [vmem:[%s778_s2 + $0x8] sm:$0xff]  ;;  %v392_v30 = vld [vmem:[%s778_s2] sm:$0xff] }
   0xf   : > { %v229_v1 = vld [vmem:[%s219_s23 + $0x20] sm:$0xff]  ;;  %v230_v2 = vld [vmem:[%s219_s23 + $0x28] sm:$0xff]  ;;  %v227_v3 = vld [vmem:[%s219_s23 + $0x10] sm:$0xff]  ;;  %s224_s20 = scalar_lea.vmem %s781_s5, %s623_s15 }
  0x10   : > { %269 = vmatpush.msra.mxu0 %v229_v1  ;;  %616 = vmatpush.msra.mxu3 %v229_v1  ;;  %v228_v5 = vld [vmem:[%s219_s23 + $0x18] sm:$0xff]  ;;  %v225_v6 = vld [vmem:[%s219_s23] sm:$0xff]  ;;  %v226_v7 = vld [vmem:[%s219_s23 + $0x8] sm:$0xff] }
  0x11   : > { %304 = vmatpush.msra.mxu1 %v230_v2  ;;  %v440_v15 = vld [vmem:[%s779_s3] sm:$0xff] }
  0x12   : > { %270 = vmatpush.msra.mxu0 %v227_v3  ;;  %617 = vmatpush.msra.mxu3 %v227_v3 }
  0x13   : > { %305 = vmatpush.msra.mxu1 %v228_v5 }
  0x14   : > { %271 = vmatpush.msra.mxu0 %v225_v6  ;;  %618 = vmatpush.msra.mxu3 %v225_v6 }
  0x15   : > { %306 = vmatpush.msra.mxu1 %v226_v7  ;;  %599 = vmatmul.msk.f32.vlgmr.msra.gmra.mxu0 %vm237_vm0, %v231_v8 }
  0x16   : > { %603 = vmatmul.msk.f32.vlgmr.msra.gmra.mxu3 %vm237_vm0, %v235_v9  ;;  %605 = vmatmul.msk.f32.vlgmr.msra.gmra.mxu1 %vm237_vm0, %v231_v8 }
  0x17   : > { %619 = vmatpush.msrb.mxu3 %v230_v2  ;;  %415 = vperm.xlu1 %637, %v395_v10  }
  0x19   : > { %620 = vmatpush.msrb.mxu3 %v228_v5 }
  0x1b   : > { %621 = vmatpush.msrb.mxu3 %v226_v7 }
  0x1d   : > { %600 = vmatmul.msk.f32.gmra.mxu0 %vm237_vm0, %v232_v11 }
  0x1e   : > { %604 = vmatmul.msk.f32.gmra.mxu3 %vm237_vm0, %v236_v12  ;;  %606 = vmatmul.msk.f32.gmra.mxu1 %vm237_vm0, %v232_v11 }
  0x25   : > { %601 = vmatmul.msk.f32.gmra.mxu0 %vm237_vm0, %v233_v13 }
  0x26   : > { %607 = vmatmul.msk.f32.gmra.mxu1 %vm237_vm0, %v233_v13  ;;  %609 = vmatmul.msk.f32.vlgmr.msrb.gmra.mxu3 %vm237_vm0, %v235_v9 }
  0x2d   : > { %602 = vmatmul.msk.f32.gmra.mxu0 %vm237_vm0, %v234_v14 }
  0x2e   : > { %610 = vmatmul.msk.f32.gmra.mxu3 %vm237_vm0, %v236_v12  ;;  %608 = vmatmul.msk.f32.gmra.mxu1 %vm237_vm0, %v234_v14 }
  0x7f   : > { %v421_v32 = vpop.permute.xlu1 %420 }
  0x80   : > { %v426_v35 = vpop.permute.xlu0 %425 }
  0x89   : > { %v416_v34 = vpop.permute.xlu1 %415 }
  0x92   : > { %v734_v16 = vpop.f32.mrf.mxu0 }
  0x93   : > { %v736_v17 = vpop.f32.mrf.mxu1  ;;  %332 = vrot.lane.b32.xlu2 %v734_v16, %s648_s17 }
  0x99   : > { %v285_v18 = vpop.f32.mrf.mxu3 }
  0x9a   : > { %340 = vrot.lane.b32.xlu1 %v285_v18, %s648_s17  ;;  %v276_v19 = vpop.f32.mrf.mxu0 }
  0x9b   : > { %v311_v20 = vpop.f32.mrf.mxu1  ;;  %334 = vrot.lane.b32.xlu2 %v276_v19, %s648_s17 }
  0x9c   : > { %364 = vrot.lane.b32.xlu0 %v311_v20, %s648_s17 }
  0xa1   : > { %v288_v21 = vpop.f32.mrf.mxu3 }
  0xa2   : > { %v279_v22 = vpop.f32.mrf.mxu0 }
  0xa3   : > { %v314_v23 = vpop.f32.mrf.mxu1  ;;  %336 = vrot.lane.b32.xlu1 %v279_v22, %s648_s17 }
  0xa4   : > { %342 = vrot.lane.b32.xlu0 %v288_v21, %s648_s17  ;;  %366 = vrot.lane.b32.xlu2 %v314_v23, %s648_s17 }
  0xa9   : > { %v320_v24 = vpop.f32.mrf.mxu3 }
  0xaa   : > { %v282_v25 = vpop.f32.mrf.mxu0 }
  0xab   : > { %370 = vrot.lane.b32.xlu1 %v320_v24, %s648_s17  ;;  %v317_v28 = vpop.f32.mrf.mxu1 }
  0xac   : > { %338 = vrot.lane.b32.xlu2 %v282_v25, %s648_s17 }
  0xb1   : > { %v323_v27 = vpop.f32.mrf.mxu3 }
  0xb2   : > { %372 = vrot.lane.b32.xlu0 %v323_v27, %s648_s17 }
  0xb3   : > { %410 = vperm.xlu1 %637, %v394_v26   ;;  %v509_v26 = vld [vmem:[%s780_s4] sm:$0xff] }
  0xb4   : > { %368 = vrot.lane.b32.xlu2 %v317_v28, %s648_s17 }
  0xba   : > { %362 = vrot.lane.b32.xlu0 %v736_v17, %s648_s17 }
  0xbc   : > { %405 = vperm.xlu2 %638, %v393_v29   ;;  %v511_v29 = vld [vmem:[%s780_s4 + $0x10] sm:$0xff] }
  0xc2   : > { %400 = vperm.xlu0 %636, %v392_v30  }
  0xed   : > { %v333_v31 = vpop.permute.xlu2 %332 }
  0xee   : > { %v350_v8 = vmax.f32 %v734_v16, %v333_v31  ;;  %v441_v16 = vld [vmem:[%s779_s3 + $0x8] sm:$0xff] }
  0xf5   : > { %v335_v33 = vpop.permute.xlu2 %334 }
  0xf6   : > { %v351_v60 = vmax.f32 %v276_v19, %v335_v33 }
  0xfe   : > { %v367_v36 = vpop.permute.xlu2 %366 }
  0xff   : > { %v382_v55 = vmax.f32 %v314_v23, %v367_v36  ;;  %v510_v23 = vld [vmem:[%s780_s4 + $0x8] sm:$0xff] }
 0x106   : > { %v339_v40 = vpop.permute.xlu2 %338 }
 0x107   : > { %v353_v48 = vmax.f32 %v282_v25, %v339_v40 }
 0x10c   : > { %v341_v37 = vpop.permute.xlu1 %340 }
 0x10d   : > { %v354_v45 = vmax.f32 %v285_v18, %v341_v37 }
 0x10e   : > { %v365_v38 = vpop.permute.xlu0 %364  ;;  %v369_v43 = vpop.permute.xlu2 %368 }
 0x10f   : > { %v383_v46 = vmax.f32 %v317_v28, %v369_v43  ;;  %v381_v56 = vmax.f32 %v311_v20, %v365_v38 }
 0x111   : > { %v389_v52 = vmax.f32 %v353_v48, %v383_v46  ;;  %v387_v2 = vmax.f32 %v351_v60, %v381_v56 }
 0x113   : > { %v431_v63 = vadd.f32 %v416_v34, %v389_v52 }
 0x115   : > { %v337_v39 = vpop.permute.xlu1 %336  ;;  %v437_v7 = vmax.f32 %v431_v63, 0.0 }
 0x116   : > { %v343_v41 = vpop.permute.xlu0 %342  ;;  %v352_v53 = vmax.f32 %v279_v22, %v337_v39  ;;  %v406_v0 = vpop.permute.xlu2 %405 }
 0x117   : > { %v355_v49 = vmax.f32 %v288_v21, %v343_v41  ;;  %v429_v5 = vadd.f32 %v406_v0, %v387_v2 }
 0x118   : > { %v388_v61 = vmax.f32 %v352_v53, %v382_v55 }
 0x119   : > { %v435_v10 = vmax.f32 %v429_v5, 0.0 }
 0x11d   : > { %v371_v42 = vpop.permute.xlu1 %370 }
 0x11e   : > { %v384_v44 = vmax.f32 %v320_v24, %v371_v42 }
 0x120   : > { %v390_v50 = vmax.f32 %v354_v45, %v384_v44 }
 0x122   : > { %v432_v58 = vadd.f32 %v421_v32, %v390_v50 }
 0x124   : > { %v373_v47 = vpop.permute.xlu0 %372  ;;  %v438_v4 = vmax.f32 %v432_v58, 0.0 }
 0x125   : > { %v385_v51 = vmax.f32 %v323_v27, %v373_v47  ;;  %v411_v59 = vpop.permute.xlu1 %410 }
 0x126   : > { %v430_v3 = vadd.f32 %v411_v59, %v388_v61 }
 0x127   : > { %v391_v54 = vmax.f32 %v355_v49, %v385_v51 }
 0x128   : > { %v436_v9 = vmax.f32 %v430_v3, 0.0 }
 0x129   : > { %v433_v57 = vadd.f32 %v426_v35, %v391_v54 }
 0x12b   : > { %v439_v62 = vmax.f32 %v433_v57, 0.0 }
 0x12c   : > { %v363_v1 = vpop.permute.xlu0 %362 }
 0x12d   : > { %463 = vmatpush.msra.mxu2 %v439_v62  ;;  %v380_v6 = vmax.f32 %v736_v17, %v363_v1  ;;  %v442_v17 = vld [vmem:[%s779_s3 + $0x10] sm:$0xff] }
 0x12f   : > { %464 = vmatpush.msra.mxu2 %v438_v4  ;;  %v386_v11 = vmax.f32 %v350_v8, %v380_v6 }
 0x131   : > { %465 = vmatpush.msra.mxu2 %v437_v7 }
 0x133   : > { %466 = vmatpush.msra.mxu2 %v436_v9 }
 0x134   : > { %v401_v12 = vpop.permute.xlu0 %400 }
 0x135   : > { %v428_v13 = vadd.f32 %v401_v12, %v386_v11  ;;  %467 = vmatpush.msra.mxu2 %v435_v10 }
 0x137   : > { %v434_v14 = vmax.f32 %v428_v13, 0.0 }
 0x139   : > { %468 = vmatpush.msra.mxu2 %v434_v14 }
 0x13a   : > { %611 = vmatmul.msk.f32.vlgmr.msra.gmra.mxu2 %vm443_vm1, %v440_v15 }
 0x142   : > { %612 = vmatmul.msk.f32.gmra.mxu2 %vm443_vm1, %v441_v16 }
 0x14a   : > { %613 = vmatmul.msk.f32.gmra.mxu2 %vm443_vm1, %v442_v17 }
 0x1bd   : > { %v470_v18 = vpop.f32.mrf.mxu2 }
 0x1be   : > { %482 = vrot.lane.b32.xlu1 %v470_v18, %s649_s7 }
 0x1c5   : > { %v473_v19 = vpop.f32.mrf.mxu2 }
 0x1c6   : > { %484 = vrot.lane.b32.xlu2 %v473_v19, %s649_s7 }
 0x1cd   : > { %v476_v20 = vpop.f32.mrf.mxu2 }
 0x1ce   : > { %486 = vrot.lane.b32.xlu0 %v476_v20, %s649_s7 }
 0x220   : > { %v485_v21 = vpop.permute.xlu2 %484 }
 0x221   : > { %v492_v22 = vmax.f32 %v473_v19, %v485_v21 }
 0x223   : > { %499 = vrot.lane.b32.xlu2 %v492_v22, %s650_s8 }
 0x22b   : > { %519 = vperm.xlu2 %638, %v510_v23  }
 0x230   : > { %v483_v24 = vpop.permute.xlu1 %482 }
 0x231   : > { %v491_v25 = vmax.f32 %v470_v18, %v483_v24 }
 0x233   : > { %497 = vrot.lane.b32.xlu1 %v491_v25, %s650_s8 }
 0x23b   : > { %514 = vperm.xlu1 %637, %v509_v26  }
 0x240   : > { %v487_v27 = vpop.permute.xlu0 %486 }
 0x241   : > { %v493_v28 = vmax.f32 %v476_v20, %v487_v27 }
 0x243   : > { %501 = vrot.lane.b32.xlu0 %v493_v28, %s650_s8 }
 0x24b   : > { %524 = vperm.xlu0 %636, %v511_v29  }
 0x27d   : > { %v500_v30 = vpop.permute.xlu2 %499 }
 0x27e   : > { %v507_v31 = vmax.f32 %v492_v22, %v500_v30 }
 0x285   : > { %v520_v32 = vpop.permute.xlu2 %519 }
 0x286   : > { %v528_v33 = vadd.f32 %v520_v32, %v507_v31 }
 0x288   : > { %v531_v34 = vmax.f32 %v528_v33, 0.0 }
 0x28a   : > { %535 = vst.msk [vmem:[%s224_s20 + $0x8] sm:$0xff] %vm533_vm2, %v531_v34 }
 0x2a5   : > { %v498_v35 = vpop.permute.xlu1 %497 }
 0x2a6   : > { %v506_v36 = vmax.f32 %v491_v25, %v498_v35 }
 0x2ad   : > { %v515_v37 = vpop.permute.xlu1 %514 }
 0x2ae   : > { %v527_v38 = vadd.f32 %v515_v37, %v506_v36 }
 0x2b0   : > { %v530_v39 = vmax.f32 %v527_v38, 0.0 }
 0x2b2   : > { %534 = vst.msk [vmem:[%s224_s20] sm:$0xff] %vm533_vm2, %v530_v39 }
 0x2b5   : > { %v502_v40 = vpop.permute.xlu0 %501 }
 0x2b6   : > { %v508_v41 = vmax.f32 %v493_v28, %v502_v40 }
 0x2bd   : > { %v525_v42 = vpop.permute.xlu0 %524 }
 0x2be   : > { %v529_v43 = vadd.f32 %v525_v42, %v508_v41 }
 0x2c0   : > { %v532_v44 = vmax.f32 %v529_v43, 0.0 }
 0x2c2   : > { %536 = vst.msk [vmem:[%s224_s20 + $0x10] sm:$0xff] %vm533_vm2, %v532_v44 }
 0x2c3 PF: > { %s15_s18 = sadd.s32 1, %s645_s18  }
 0x2c4   : > { %p12_p4 = scmp.ge.s32.totalorder %s15_s18, 4  }
 0x2c6   :  { %14 = sbr.rel (!%p12_p4) target bundleno = 1 (0x1), region = 70 }

</bundles_post_ra>
